<compile_context>
chip_gen: v7x
topology: tpu7x:2x2x1
jax: 0.10.0
libtpu: 0.0.40
codegen_flags: <defaults>
</compile_context>

<pallas_src>
import numpy as np
import jax
import jax.numpy as jnp
from jax import lax
from jax.experimental import pallas as pl
from jax.experimental.pallas import tpu as pltpu


# ----------------------------------------------------------------------------
# SMPLH kinematic tree (52 joints): 22 body + 15 left-hand + 15 right-hand
# ----------------------------------------------------------------------------
PARENTS = (
    [-1, 0, 0, 0, 1, 2, 3, 4, 5, 6, 7, 8, 9, 9, 9, 12, 13, 14, 16, 17, 18, 19]
    + [20, 22, 23, 20, 25, 26, 20, 28, 29, 20, 31, 32, 20, 34, 35]      # L hand
    + [21, 37, 38, 21, 40, 41, 21, 43, 44, 21, 46, 47, 21, 49, 50]      # R hand
)

# loss weights ("config")
WEIGHTS = {'rotation': 1.0, 'translation': 1.0, 'landmark': 1.0,
           'pose': 0.1, 'shape': 0.01}


# ----------------------------------------------------------------------------
# Pallas kernel: all loss reductions fused, one packed (1, 8) output
# ----------------------------------------------------------------------------
def _make_fused_kernel(nr, nl, nj, np6, nsh):
    """Build the fused loss kernel for static problem sizes.

    nr  : number of rotations          (trace -> clip -> acos -> mean)
    nl  : number of landmarks
    nj  : number of joints             (L1 .sum(-1).mean() => sum / nj)
    np6 : number of predicted 6D poses (L1 mean over np6*6 elements)
    nsh : number of shape elements     (L1 mean over nsh elements)
    """
    b_joint = 3 * nj          # lane boundary: joints | pose6d
    b_pose = b_joint + 6 * np6  # lane boundary: pose6d | shape

    def _acos(x):
        # Abramowitz & Stegun 4.4.45 minimax polynomial (|err| <= 2e-8).
        # VPU mul/add + one sqrt only -> guaranteed Mosaic lowering.
        ax = jnp.abs(x)
        p = jnp.float32(-0.0012624911)
        for c in (0.0066700901, -0.0170881256, 0.0308918810, -0.0501743046,
                  0.0889789874, -0.2145988016, 1.5707963050):
            p = p * ax + jnp.float32(c)
        r = jnp.sqrt(1.0 - ax) * p
        return jnp.where(x < 0.0, jnp.float32(np.pi) - r, r)

    def kernel(rp_ref, rg_ref, lp_ref, lg_ref, dp_ref, dg_ref, out_ref):
        # --- RotationLoss: trace(R_hat @ R_gt^T) == sum(R_hat * R_gt) --------
        trace = jnp.sum(rp_ref[...] * rg_ref[...], axis=0, keepdims=True)  # (1, NR)
        ct = jnp.clip(0.5 * (trace - 1.0), -1.0 + 1e-6, 1.0 - 1e-6)
        rot = jnp.sum(_acos(ct), axis=1, keepdims=True) * (1.0 / nr)       # (1, 1)

        # --- ProbabilisticLandmarkLoss + landmark MSE + mean_std -------------
        # TODO(synk): like the reference, logvar is NOT clamped; extreme
        #             predicted logvar can overflow exp (same semantics).
        mu = lp_ref[0:2, :]                       # (2, NL)
        logvar = lp_ref[2:3, :]                   # (1, NL)
        diff = mu - lg_ref[...]                   # (2, NL)
        sq = jnp.sum(diff * diff, axis=0, keepdims=True)                   # (1, NL)
        e = jnp.exp(-0.5 * logvar)                # single EUP exp
        nll = logvar + 0.5 * sq * (e * e)         # exp(-logvar) = e*e
        lm = jnp.sum(nll, axis=1, keepdims=True) * (1.0 / nl)
        mse = jnp.sum(sq, axis=1, keepdims=True) * (1.0 / (nl * 2))
        std = jnp.sum(pl.reciprocal(e, approx=True),                        # exp(+lv/2)
                      axis=1, keepdims=True) * (1.0 / nl)

        # --- packed L1 slab [joints | pose6d | shape]: segmented reductions --
        lane = lax.broadcasted_iota(jnp.int32, dp_ref.shape, 1)             # (1, ND)
        d = jnp.abs(dp_ref[...] - dg_ref[...])
        joint = jnp.sum(jnp.where(lane < b_joint, d, 0.0),
                        axis=1, keepdims=True) * (1.0 / nj)
        pose = jnp.sum(jnp.where((lane >= b_joint) & (lane < b_pose), d, 0.0),
                       axis=1, keepdims=True) * (1.0 / (6 * np6))
        shp = jnp.sum(jnp.where(lane >= b_pose, d, 0.0),
                      axis=1, keepdims=True) * (1.0 / nsh)

        # --- single packed output: one store instead of seven ----------------
        slot = lax.broadcasted_iota(jnp.int32, (1, 8), 1)
        out_ref[...] = (jnp.where(slot == 0, rot, 0.0)
                        + jnp.where(slot == 1, joint, 0.0)
                        + jnp.where(slot == 2, lm, 0.0)
                        + jnp.where(slot == 3, mse, 0.0)
                        + jnp.where(slot == 4, std, 0.0)
                        + jnp.where(slot == 5, pose, 0.0)
                        + jnp.where(slot == 6, shp, 0.0))

    return kernel


def fused_losses(rp, rg, lp, lg, dp, dg, *, nj, np6, nsh):
    nr = rp.shape[1]
    nl = lp.shape[1]
    vmem = pl.BlockSpec(memory_space=pltpu.MemorySpace.VMEM)
    # TODO(synk): if B grows large, tile the lane axis with a 1-D "parallel"
    #             grid (v7x: 2 TCs, 64 MiB VMEM); at these sizes a single
    #             gridless, whole-array-resident call is optimal.
    return pl.pallas_call(
        _make_fused_kernel(nr, nl, nj, np6, nsh),
        out_shape=jax.ShapeDtypeStruct((1, 8), jnp.float32),
        in_specs=[vmem] * 6,
        out_specs=vmem,
    )(rp, rg, lp, lg, dp, dg)


# ----------------------------------------------------------------------------
# Rotation-representation glue (plain JAX, tiny per-joint math)
# ----------------------------------------------------------------------------
def aa2rot(aa):
    """axis-angle (..., 3) -> rotation matrix (..., 3, 3) via Rodrigues."""
    angle = jnp.linalg.norm(aa, axis=-1, keepdims=True)
    axis = aa / jnp.where(angle > 1e-8, angle, 1.0)
    x, y, z = axis[..., 0], axis[..., 1], axis[..., 2]
    a = angle[..., 0]
    c, s = jnp.cos(a), jnp.sin(a)
    C = 1.0 - c
    R = jnp.stack([
        jnp.stack([c + x * x * C, x * y * C - z * s, x * z * C + y * s], -1),
        jnp.stack([y * x * C + z * s, c + y * y * C, y * z * C - x * s], -1),
        jnp.stack([z * x * C - y * s, z * y * C + x * s, c + z * z * C], -1),
    ], axis=-2)
    return R


def matrix_to_rotation_6d(m):
    return m[..., :2, :].reshape(m.shape[:-2] + (6,))


def rotation_6d_to_matrix(d6):
    a1, a2 = d6[..., :3], d6[..., 3:]
    b1 = a1 / jnp.linalg.norm(a1, axis=-1, keepdims=True)
    b2 = a2 - jnp.sum(b1 * a2, axis=-1, keepdims=True) * b1
    b2 = b2 / jnp.linalg.norm(b2, axis=-1, keepdims=True)
    b3 = jnp.cross(b1, b2)
    return jnp.stack([b1, b2, b3], axis=-2)


def local_to_global(R_local):
    """(B, 52, 3, 3) local rotmats -> global rotmats along the kinematic chain."""
    Rs = [R_local[:, 0]]
    for j in range(1, R_local.shape[1]):
        Rs.append(jnp.einsum('bij,bjk->bik', Rs[PARENTS[j]], R_local[:, j]))
    return jnp.stack(Rs, axis=1)


# ----------------------------------------------------------------------------
# Synthetic deterministic SMPLH layer (joint regressor + forward kinematics)
# TODO(synk): real SMPLH model data is not loadable here; this is a
#             deterministic synthetic stand-in with the same interface/shapes.
# ----------------------------------------------------------------------------
class SyntheticSMPLH:
    def __init__(self, key):
        k1, k2 = jax.random.split(key)
        self.j_template = jax.random.normal(k1, (52, 3), jnp.float32) * 0.2
        self.shape_dirs = jax.random.normal(k2, (52, 3, 16), jnp.float32) * 0.01

    def joints(self, betas, pose_rotmat, transl):
        """betas (B,16), pose (B,52,3,3), transl (B,3) -> joints (B,52,3)."""
        j = self.j_template[None] + jnp.einsum('bs,jcs->bjc', betas, self.shape_dirs)
        Rg = local_to_global(pose_rotmat)
        pos = [j[:, 0]]
        for jt in range(1, 52):
            p = PARENTS[jt]
            off = j[:, jt] - j[:, p]
            pos.append(pos[p] + jnp.einsum('bij,bj->bi', Rg[:, p], off))
        return jnp.stack(pos, axis=1) + transl[:, None, :]


# ----------------------------------------------------------------------------
# DNNMultiTaskLoss.forward
# ----------------------------------------------------------------------------
def dnn_multitask_loss(outputs, targets, smplh):
    body = 'shape' in outputs
    gt_pose_aa = targets['pose']                       # (B, 52, 3)
    pred_pose_6d = outputs['pose']                     # (B, 21|15, 6)
    B = gt_pose_aa.shape[0]

    gt_pose_rotmat = aa2rot(gt_pose_aa)                # (B, 52, 3, 3)
    gt_global_rot = local_to_global(gt_pose_rotmat)
    if body:
        gt_pose_6d = matrix_to_rotation_6d(gt_pose_rotmat[:, 1:22])
    else:
        gt_pose_6d = matrix_to_rotation_6d(gt_pose_rotmat[:, 22:37])
    pred_pose_rotmat = rotation_6d_to_matrix(pred_pose_6d)

    gt_shape = targets['shape']                        # (B, 16)
    if body:
        full_shape = jnp.concatenate([outputs['shape'], gt_shape[:, -6:]], axis=1)
        full_pose = jnp.concatenate(
            [gt_pose_rotmat[:, 0:1], pred_pose_rotmat, gt_pose_rotmat[:, 22:]], axis=1)
        sp = outputs['shape'].astype(jnp.float32)
        sg = gt_shape[:, :10].astype(jnp.float32)
    else:
        full_shape = gt_shape
        full_pose = jnp.concatenate(
            [gt_pose_rotmat[:, :22], pred_pose_rotmat, gt_pose_rotmat[:, 37:]], axis=1)
        sp = jnp.zeros((B, 10), jnp.float32)
        sg = jnp.zeros((B, 10), jnp.float32)

    pred_global_rot = local_to_global(full_pose)
    translation = targets['translation']
    gt_joints = smplh.joints(gt_shape, gt_pose_rotmat, translation)[:, :52]
    pred_joints = smplh.joints(full_shape, full_pose, translation)[:, :52]

    if not body:
        gt_global_rot = gt_global_rot[:, 22:37]
        pred_global_rot = pred_global_rot[:, 22:37]
        gt_joints = gt_joints[:, 22:37]
        pred_joints = pred_joints[:, 22:37]

    # --- lane-dense kernel operands (row axis -> lanes); wrapper-side layout
    #     plumbing only, no compute hoisted ----------------------------------
    f32 = jnp.float32
    rp = pred_global_rot.reshape(-1, 9).T.astype(f32)          # (9, NR)
    rg = gt_global_rot.reshape(-1, 9).T.astype(f32)            # (9, NR)
    lp = outputs['landmarks'].reshape(-1, 3).T.astype(f32)     # (3, NL)
    lg = targets['landmarks'].reshape(-1, 2).T.astype(f32)     # (2, NL)
    # single packed L1 slab pair: [joints | pose6d | shape]
    dp = jnp.concatenate([pred_joints.reshape(1, -1),
                          pred_pose_6d.reshape(1, -1),
                          sp.reshape(1, -1)], axis=1).astype(f32)   # (1, ND)
    dg = jnp.concatenate([gt_joints.reshape(1, -1),
                          gt_pose_6d.reshape(1, -1),
                          sg.reshape(1, -1)], axis=1).astype(f32)   # (1, ND)

    nj = pred_joints.shape[0] * pred_joints.shape[1]
    np6 = pred_pose_6d.shape[0] * pred_pose_6d.shape[1]
    nsh = sp.shape[0] * sp.shape[1]

    packed = fused_losses(rp, rg, lp, lg, dp, dg, nj=nj, np6=np6, nsh=nsh)

    rot_loss = packed[0, 0]
    joint_loss = packed[0, 1]
    landmark_loss = packed[0, 2]
    mse_loss = packed[0, 3]
    mean_std = packed[0, 4]
    pose_loss = packed[0, 5]
    shape_loss = packed[0, 6]

    total = (WEIGHTS['rotation'] * rot_loss
             + WEIGHTS['translation'] * joint_loss
             + WEIGHTS['landmark'] * landmark_loss
             + WEIGHTS['pose'] * pose_loss
             + (WEIGHTS['shape'] * shape_loss if body else 0.0))

    loss_dict = {'total': total, 'rotation': rot_loss, 'translation': joint_loss,
                 'landmark': landmark_loss, 'pose': pose_loss,
                 'landmark_mse': mse_loss, 'mean_std': mean_std}
    if body:
        loss_dict['shape'] = shape_loss
    return loss_dict


# ----------------------------------------------------------------------------
if __name__ == "__main__":
    key = jax.random.PRNGKey(0)
    keys = jax.random.split(key, 8)

    B, L = 2, 8          # batch, num landmarks; body-case pose prediction (21 joints)

    smplh = SyntheticSMPLH(keys[0])

    outputs = {
        'pose': jax.random.normal(keys[1], (B, 21, 6), jnp.float32),
        'landmarks': jax.random.normal(keys[2], (B, L, 3), jnp.float32) * 0.5,
        'shape': jax.random.normal(keys[3], (B, 10), jnp.float32) * 0.5,
    }
    targets = {
        'pose': jax.random.normal(keys[4], (B, 52, 3), jnp.float32) * 0.3,
        'shape': jax.random.normal(keys[5], (B, 16), jnp.float32) * 0.5,
        'translation': jax.random.normal(keys[6], (B, 3), jnp.float32) * 0.1,
        'landmarks': jax.random.normal(keys[7], (B, L, 2), jnp.float32) * 0.5,
    }

    losses = dnn_multitask_loss(outputs, targets, smplh)
    jax.block_until_ready(losses['total'])

    for k, v in losses.items():
        assert np.isfinite(np.asarray(v)).all(), f"non-finite loss term: {k}"

    print("KERNEL_OK")
</pallas_src>

<mosaic_0001>
module attributes {stable_mosaic.version = 11 : i64} {
  func.func @kernel(%arg0: memref<9x104xf32, #tpu.memory_space<vmem>>, %arg1: memref<9x104xf32, #tpu.memory_space<vmem>>, %arg2: memref<3x16xf32, #tpu.memory_space<vmem>>, %arg3: memref<2x16xf32, #tpu.memory_space<vmem>>, %arg4: memref<1x584xf32, #tpu.memory_space<vmem>>, %arg5: memref<1x584xf32, #tpu.memory_space<vmem>>, %arg6: memref<1x8xf32, #tpu.memory_space<vmem>>) attributes {dimension_semantics = [], scalar_prefetch = 0 : i64, scratch_operands = 0 : i64, tpu.core_type = #tpu.core_type<tc>} {
    %c0 = arith.constant 0 : index
    %c0_0 = arith.constant 0 : index
    %0 = vector.load %arg0[%c0, %c0_0] : memref<9x104xf32, #tpu.memory_space<vmem>>, vector<9x104xf32>
    %c0_1 = arith.constant 0 : index
    %c0_2 = arith.constant 0 : index
    %1 = vector.load %arg1[%c0_1, %c0_2] : memref<9x104xf32, #tpu.memory_space<vmem>>, vector<9x104xf32>
    %2 = arith.mulf %0, %1 : vector<9x104xf32>
    %cst = arith.constant dense<0.000000e+00> : vector<104xf32>
    %3 = vector.multi_reduction <add>, %2, %cst [0] : vector<9x104xf32> to vector<104xf32>
    %4 = vector.shape_cast %3 : vector<104xf32> to vector<1x104xf32>
    %cst_3 = arith.constant 1.000000e+00 : f32
    %5 = vector.broadcast %cst_3 : f32 to vector<1x104xf32>
    %6 = arith.subf %4, %5 : vector<1x104xf32>
    %cst_4 = arith.constant 5.000000e-01 : f32
    %7 = vector.broadcast %cst_4 : f32 to vector<1x104xf32>
    %8 = arith.mulf %7, %6 : vector<1x104xf32>
    %cst_5 = arith.constant -0.999998986 : f32
    %cst_6 = arith.constant 0.999998986 : f32
    %9 = vector.broadcast %cst_5 : f32 to vector<1x104xf32>
    %10 = arith.maximumf %9, %8 : vector<1x104xf32>
    %11 = vector.broadcast %cst_6 : f32 to vector<1x104xf32>
    %12 = arith.minimumf %11, %10 : vector<1x104xf32>
    %13 = math.absf %12 : vector<1x104xf32>
    %cst_7 = arith.constant -0.0012624911 : f32
    %14 = vector.broadcast %cst_7 : f32 to vector<1x104xf32>
    %15 = arith.mulf %14, %13 : vector<1x104xf32>
    %cst_8 = arith.constant 6.670090e-03 : f32
    %16 = vector.broadcast %cst_8 : f32 to vector<1x104xf32>
    %17 = arith.addf %15, %16 : vector<1x104xf32>
    %18 = arith.mulf %17, %13 : vector<1x104xf32>
    %cst_9 = arith.constant -0.0170881264 : f32
    %19 = vector.broadcast %cst_9 : f32 to vector<1x104xf32>
    %20 = arith.addf %18, %19 : vector<1x104xf32>
    %21 = arith.mulf %20, %13 : vector<1x104xf32>
    %cst_10 = arith.constant 0.0308918804 : f32
    %22 = vector.broadcast %cst_10 : f32 to vector<1x104xf32>
    %23 = arith.addf %21, %22 : vector<1x104xf32>
    %24 = arith.mulf %23, %13 : vector<1x104xf32>
    %cst_11 = arith.constant -0.0501743034 : f32
    %25 = vector.broadcast %cst_11 : f32 to vector<1x104xf32>
    %26 = arith.addf %24, %25 : vector<1x104xf32>
    %27 = arith.mulf %26, %13 : vector<1x104xf32>
    %cst_12 = arith.constant 0.0889789909 : f32
    %28 = vector.broadcast %cst_12 : f32 to vector<1x104xf32>
    %29 = arith.addf %27, %28 : vector<1x104xf32>
    %30 = arith.mulf %29, %13 : vector<1x104xf32>
    %cst_13 = arith.constant -0.214598805 : f32
    %31 = vector.broadcast %cst_13 : f32 to vector<1x104xf32>
    %32 = arith.addf %30, %31 : vector<1x104xf32>
    %33 = arith.mulf %32, %13 : vector<1x104xf32>
    %cst_14 = arith.constant 1.57079625 : f32
    %34 = vector.broadcast %cst_14 : f32 to vector<1x104xf32>
    %35 = arith.addf %33, %34 : vector<1x104xf32>
    %cst_15 = arith.constant 1.000000e+00 : f32
    %36 = vector.broadcast %cst_15 : f32 to vector<1x104xf32>
    %37 = arith.subf %36, %13 : vector<1x104xf32>
    %38 = math.sqrt %37 : vector<1x104xf32>
    %39 = arith.mulf %38, %35 : vector<1x104xf32>
    %cst_16 = arith.constant 0.000000e+00 : f32
    %40 = vector.broadcast %cst_16 : f32 to vector<1x104xf32>
    %41 = arith.cmpf olt, %12, %40 : vector<1x104xf32>
    %cst_17 = arith.constant 3.14159274 : f32
    %42 = vector.broadcast %cst_17 : f32 to vector<1x104xf32>
    %43 = arith.subf %42, %39 : vector<1x104xf32>
    %44 = arith.select %41, %43, %39 : vector<1x104xi1>, vector<1x104xf32>
    %cst_18 = arith.constant dense<0.000000e+00> : vector<1xf32>
    %45 = vector.multi_reduction <add>, %44, %cst_18 [1] : vector<1x104xf32> to vector<1xf32>
    %46 = vector.shape_cast %45 : vector<1xf32> to vector<1x1xf32>
    %cst_19 = arith.constant 0.00961538497 : f32
    %47 = vector.broadcast %cst_19 : f32 to vector<1x1xf32>
    %48 = arith.mulf %46, %47 : vector<1x1xf32>
    %c0_20 = arith.constant 0 : index
    %c0_21 = arith.constant 0 : index
    %49 = vector.load %arg2[%c0_20, %c0_21] : memref<3x16xf32, #tpu.memory_space<vmem>>, vector<2x16xf32>
    %c2 = arith.constant 2 : index
    %c0_22 = arith.constant 0 : index
    %50 = vector.load %arg2[%c2, %c0_22] : memref<3x16xf32, #tpu.memory_space<vmem>>, vector<1x16xf32>
    %c0_23 = arith.constant 0 : index
    %c0_24 = arith.constant 0 : index
    %51 = vector.load %arg3[%c0_23, %c0_24] : memref<2x16xf32, #tpu.memory_space<vmem>>, vector<2x16xf32>
    %52 = arith.subf %49, %51 : vector<2x16xf32>
    %53 = arith.mulf %52, %52 : vector<2x16xf32>
    %cst_25 = arith.constant dense<0.000000e+00> : vector<16xf32>
    %54 = vector.multi_reduction <add>, %53, %cst_25 [0] : vector<2x16xf32> to vector<16xf32>
    %55 = vector.shape_cast %54 : vector<16xf32> to vector<1x16xf32>
    %cst_26 = arith.constant -5.000000e-01 : f32
    %56 = vector.broadcast %cst_26 : f32 to vector<1x16xf32>
    %57 = arith.mulf %56, %50 : vector<1x16xf32>
    %58 = math.exp %57 : vector<1x16xf32>
    %cst_27 = arith.constant 5.000000e-01 : f32
    %59 = vector.broadcast %cst_27 : f32 to vector<1x16xf32>
    %60 = arith.mulf %59, %55 : vector<1x16xf32>
    %61 = arith.mulf %58, %58 : vector<1x16xf32>
    %62 = arith.mulf %60, %61 : vector<1x16xf32>
    %63 = arith.addf %50, %62 : vector<1x16xf32>
    %cst_28 = arith.constant dense<0.000000e+00> : vector<1xf32>
    %64 = vector.multi_reduction <add>, %63, %cst_28 [1] : vector<1x16xf32> to vector<1xf32>
    %65 = vector.shape_cast %64 : vector<1xf32> to vector<1x1xf32>
    %cst_29 = arith.constant 6.250000e-02 : f32
    %66 = vector.broadcast %cst_29 : f32 to vector<1x1xf32>
    %67 = arith.mulf %65, %66 : vector<1x1xf32>
    %cst_30 = arith.constant dense<0.000000e+00> : vector<1xf32>
    %68 = vector.multi_reduction <add>, %55, %cst_30 [1] : vector<1x16xf32> to vector<1xf32>
    %69 = vector.shape_cast %68 : vector<1xf32> to vector<1x1xf32>
    %cst_31 = arith.constant 3.125000e-02 : f32
    %70 = vector.broadcast %cst_31 : f32 to vector<1x1xf32>
    %71 = arith.mulf %69, %70 : vector<1x1xf32>
    %72 = tpu.reciprocal %58 {approx = true} : vector<1x16xf32> -> vector<1x16xf32>
    %cst_32 = arith.constant dense<0.000000e+00> : vector<1xf32>
    %73 = vector.multi_reduction <add>, %72, %cst_32 [1] : vector<1x16xf32> to vector<1xf32>
    %74 = vector.shape_cast %73 : vector<1xf32> to vector<1x1xf32>
    %cst_33 = arith.constant 6.250000e-02 : f32
    %75 = vector.broadcast %cst_33 : f32 to vector<1x1xf32>
    %76 = arith.mulf %74, %75 : vector<1x1xf32>
    %77 = tpu.iota {dimensions = array<i32: 1>} : vector<1x584xi32>
    %c0_34 = arith.constant 0 : index
    %c0_35 = arith.constant 0 : index
    %78 = vector.load %arg4[%c0_34, %c0_35] : memref<1x584xf32, #tpu.memory_space<vmem>>, vector<1x584xf32>
    %c0_36 = arith.constant 0 : index
    %c0_37 = arith.constant 0 : index
    %79 = vector.load %arg5[%c0_36, %c0_37] : memref<1x584xf32, #tpu.memory_space<vmem>>, vector<1x584xf32>
    %80 = arith.subf %78, %79 : vector<1x584xf32>
    %81 = math.absf %80 : vector<1x584xf32>
    %c312_i32 = arith.constant 312 : i32
    %82 = vector.broadcast %c312_i32 : i32 to vector<1x584xi32>
    %83 = arith.cmpi slt, %77, %82 : vector<1x584xi32>
    %cst_38 = arith.constant 0.000000e+00 : f32
    %84 = vector.broadcast %cst_38 : f32 to vector<1x584xf32>
    %85 = arith.select %83, %81, %84 : vector<1x584xi1>, vector<1x584xf32>
    %cst_39 = arith.constant dense<0.000000e+00> : vector<1xf32>
    %86 = vector.multi_reduction <add>, %85, %cst_39 [1] : vector<1x584xf32> to vector<1xf32>
    %87 = vector.shape_cast %86 : vector<1xf32> to vector<1x1xf32>
    %cst_40 = arith.constant 0.00961538497 : f32
    %88 = vector.broadcast %cst_40 : f32 to vector<1x1xf32>
    %89 = arith.mulf %87, %88 : vector<1x1xf32>
    %c312_i32_41 = arith.constant 312 : i32
    %90 = vector.broadcast %c312_i32_41 : i32 to vector<1x584xi32>
    %91 = arith.cmpi sge, %77, %90 : vector<1x584xi32>
    %c564_i32 = arith.constant 564 : i32
    %92 = vector.broadcast %c564_i32 : i32 to vector<1x584xi32>
    %93 = arith.cmpi slt, %77, %92 : vector<1x584xi32>
    %94 = arith.andi %91, %93 : vector<1x584xi1>
    %cst_42 = arith.constant 0.000000e+00 : f32
    %95 = vector.broadcast %cst_42 : f32 to vector<1x584xf32>
    %96 = arith.select %94, %81, %95 : vector<1x584xi1>, vector<1x584xf32>
    %cst_43 = arith.constant dense<0.000000e+00> : vector<1xf32>
    %97 = vector.multi_reduction <add>, %96, %cst_43 [1] : vector<1x584xf32> to vector<1xf32>
    %98 = vector.shape_cast %97 : vector<1xf32> to vector<1x1xf32>
    %cst_44 = arith.constant 0.0039682542 : f32
    %99 = vector.broadcast %cst_44 : f32 to vector<1x1xf32>
    %100 = arith.mulf %98, %99 : vector<1x1xf32>
    %c564_i32_45 = arith.constant 564 : i32
    %101 = vector.broadcast %c564_i32_45 : i32 to vector<1x584xi32>
    %102 = arith.cmpi sge, %77, %101 : vector<1x584xi32>
    %cst_46 = arith.constant 0.000000e+00 : f32
    %103 = vector.broadcast %cst_46 : f32 to vector<1x584xf32>
    %104 = arith.select %102, %81, %103 : vector<1x584xi1>, vector<1x584xf32>
    %cst_47 = arith.constant dense<0.000000e+00> : vector<1xf32>
    %105 = vector.multi_reduction <add>, %104, %cst_47 [1] : vector<1x584xf32> to vector<1xf32>
    %106 = vector.shape_cast %105 : vector<1xf32> to vector<1x1xf32>
    %cst_48 = arith.constant 5.000000e-02 : f32
    %107 = vector.broadcast %cst_48 : f32 to vector<1x1xf32>
    %108 = arith.mulf %106, %107 : vector<1x1xf32>
    %109 = tpu.iota {dimensions = array<i32: 1>} : vector<1x8xi32>
    %c0_i32 = arith.constant 0 : i32
    %110 = vector.broadcast %c0_i32 : i32 to vector<1x8xi32>
    %111 = arith.cmpi eq, %109, %110 : vector<1x8xi32>
    %cst_49 = arith.constant 0.000000e+00 : f32
    %112 = vector.shape_cast %48 : vector<1x1xf32> to vector<1x1xf32>
    %113 = vector.broadcast %112 : vector<1x1xf32> to vector<1x8xf32>
    %114 = vector.broadcast %cst_49 : f32 to vector<1x8xf32>
    %115 = arith.select %111, %113, %114 : vector<1x8xi1>, vector<1x8xf32>
    %c1_i32 = arith.constant 1 : i32
    %116 = vector.broadcast %c1_i32 : i32 to vector<1x8xi32>
    %117 = arith.cmpi eq, %109, %116 : vector<1x8xi32>
    %cst_50 = arith.constant 0.000000e+00 : f32
    %118 = vector.shape_cast %89 : vector<1x1xf32> to vector<1x1xf32>
    %119 = vector.broadcast %118 : vector<1x1xf32> to vector<1x8xf32>
    %120 = vector.broadcast %cst_50 : f32 to vector<1x8xf32>
    %121 = arith.select %117, %119, %120 : vector<1x8xi1>, vector<1x8xf32>
    %122 = arith.addf %115, %121 : vector<1x8xf32>
    %c2_i32 = arith.constant 2 : i32
    %123 = vector.broadcast %c2_i32 : i32 to vector<1x8xi32>
    %124 = arith.cmpi eq, %109, %123 : vector<1x8xi32>
    %cst_51 = arith.constant 0.000000e+00 : f32
    %125 = vector.shape_cast %67 : vector<1x1xf32> to vector<1x1xf32>
    %126 = vector.broadcast %125 : vector<1x1xf32> to vector<1x8xf32>
    %127 = vector.broadcast %cst_51 : f32 to vector<1x8xf32>
    %128 = arith.select %124, %126, %127 : vector<1x8xi1>, vector<1x8xf32>
    %129 = arith.addf %122, %128 : vector<1x8xf32>
    %c3_i32 = arith.constant 3 : i32
    %130 = vector.broadcast %c3_i32 : i32 to vector<1x8xi32>
    %131 = arith.cmpi eq, %109, %130 : vector<1x8xi32>
    %cst_52 = arith.constant 0.000000e+00 : f32
    %132 = vector.shape_cast %71 : vector<1x1xf32> to vector<1x1xf32>
    %133 = vector.broadcast %132 : vector<1x1xf32> to vector<1x8xf32>
    %134 = vector.broadcast %cst_52 : f32 to vector<1x8xf32>
    %135 = arith.select %131, %133, %134 : vector<1x8xi1>, vector<1x8xf32>
    %136 = arith.addf %129, %135 : vector<1x8xf32>
    %c4_i32 = arith.constant 4 : i32
    %137 = vector.broadcast %c4_i32 : i32 to vector<1x8xi32>
    %138 = arith.cmpi eq, %109, %137 : vector<1x8xi32>
    %cst_53 = arith.constant 0.000000e+00 : f32
    %139 = vector.shape_cast %76 : vector<1x1xf32> to vector<1x1xf32>
    %140 = vector.broadcast %139 : vector<1x1xf32> to vector<1x8xf32>
    %141 = vector.broadcast %cst_53 : f32 to vector<1x8xf32>
    %142 = arith.select %138, %140, %141 : vector<1x8xi1>, vector<1x8xf32>
    %143 = arith.addf %136, %142 : vector<1x8xf32>
    %c5_i32 = arith.constant 5 : i32
    %144 = vector.broadcast %c5_i32 : i32 to vector<1x8xi32>
    %145 = arith.cmpi eq, %109, %144 : vector<1x8xi32>
    %cst_54 = arith.constant 0.000000e+00 : f32
    %146 = vector.shape_cast %100 : vector<1x1xf32> to vector<1x1xf32>
    %147 = vector.broadcast %146 : vector<1x1xf32> to vector<1x8xf32>
    %148 = vector.broadcast %cst_54 : f32 to vector<1x8xf32>
    %149 = arith.select %145, %147, %148 : vector<1x8xi1>, vector<1x8xf32>
    %150 = arith.addf %143, %149 : vector<1x8xf32>
    %c6_i32 = arith.constant 6 : i32
    %151 = vector.broadcast %c6_i32 : i32 to vector<1x8xi32>
    %152 = arith.cmpi eq, %109, %151 : vector<1x8xi32>
    %cst_55 = arith.constant 0.000000e+00 : f32
    %153 = vector.shape_cast %108 : vector<1x1xf32> to vector<1x1xf32>
    %154 = vector.broadcast %153 : vector<1x1xf32> to vector<1x8xf32>
    %155 = vector.broadcast %cst_55 : f32 to vector<1x8xf32>
    %156 = arith.select %152, %154, %155 : vector<1x8xi1>, vector<1x8xf32>
    %157 = arith.addf %150, %156 : vector<1x8xf32>
    %c0_56 = arith.constant 0 : index
    %c0_57 = arith.constant 0 : index
    %158 = vector.load %arg6[%c0_56, %c0_57] : memref<1x8xf32, #tpu.memory_space<vmem>>, vector<1x8xf32>
    tpu.vector_store %arg6[%c0_56, %c0_57], %157 {strides = array<i32>} : memref<1x8xf32, #tpu.memory_space<vmem>>, vector<1x8xf32>,
    return
  }
}

</mosaic_0001>

<bundles_post_ra>
// kernel: tpu_custom_call.1
= control target key start
LH: loop header
LB: loop body
LE: loop exit
PB: predicated region body
PF: predicated region fallthrough
CT: control target
= control target key end

     0   :  { %11 = vsyncpa [#allocation3], 0  ;;  %s609_s0 = inlined_call_operand.hbm [shape: f32[9,104], index: 0, kind: input, shape index: {}]   ;;  %s610_s1 = inlined_call_operand.hbm [shape: f32[9,104], index: 1, kind: input, shape index: {}]   ;;  %s611_s2 = inlined_call_operand.hbm [shape: f32[3,16], index: 2, kind: input, shape index: {}]   ;;  %s612_s3 = inlined_call_operand.hbm [shape: f32[2,16], index: 3, kind: input, shape index: {}]   ;;  %s613_s4 = inlined_call_operand.vmem [shape: f32[1,584], index: 4, kind: input, shape index: {}]   ;;  %s614_s5 = inlined_call_operand.vmem [shape: f32[1,584], index: 5, kind: input, shape index: {}]   ;;  %s615_s6 = inlined_call_operand.hbm [shape: f32[1,8], index: 6, kind: output, shape index: {}]  }
   0x1   :  { %12 = vsyncpa [#allocation6], 0 }
   0x2   :  { %13 = vsyncpa [#allocation9], 0 }
   0x3   :  { %14 = vsyncpa [#allocation4], 0  ;;  %s448_s21 = smov [#allocation5]   ;;  %s449_s23 = smov [#allocation2]  }
   0x4   :  { %s32_s22 = sshll.u32 %s448_s21, 4  ;;  %s20_s24 = sshll.u32 %s449_s23, 4  ;;  %s33_s22 = int_to_ptr.vmem [resolvable:$true] %s32_s22  ;;  %s490_s24 = int_to_ptr.vmem [resolvable:$true] %s20_s24 }
   0x5   :  { %s330_s27 = scalar_lea.hbm %s610_s1, 256 }
   0x6   :  { %p331_p0 = scmp.ne.s32.totalorder %s610_s1, %s330_s27  ;;  %p334_p1 = scmp.lt.u32.totalorder %s330_s27, %s610_s1 }
   0x8   :  { %p336_p2 = pnand %p334_p1, %p331_p0 }
   0xa   :  { %339 = shalt.err (!%p336_p2)
}
   0xb   :  { %s340_s8 = scalar_lea.vmem %s33_s22, 256  ;;  %p345_p4 = scmp.lt.s32.totalorder %s33_s22, %s33_s22 }
   0xc   :  { %p341_p3 = scmp.ne.s32.totalorder %s33_s22, %s340_s8  ;;  %p346_p5 = scmp.lt.s32.totalorder %s340_s8, %s340_s8 }
   0xe   :  { %p347_p6 = por %p346_p5, %p345_p4 }
  0x10   :  { %p348_p7 = pnand %p347_p6, %p341_p3 }
  0x12   :  { %351 = shalt.err (!%p348_p7)
}
  0x13   :  { %s450_s9 = smov 128   ;;  %s451_s10 = smov 8  }
  0x14   :  { %38 = dma.hbm_to_vmem [thread:$0]  %s610_s1, 256, %s33_s22, [#allocation6], %s450_s9, %s450_s9, %s451_s10  }
  0x15   :  { %s352_s15 = scalar_lea.hbm %s609_s0, 256 }
  0x16   :  { %p353_p8 = scmp.ne.s32.totalorder %s609_s0, %s352_s15  ;;  %p356_p9 = scmp.lt.u32.totalorder %s352_s15, %s609_s0 }
  0x18   :  { %p358_p10 = pnand %p356_p9, %p353_p8 }
  0x1a   :  { %361 = shalt.err (!%p358_p10)
}
  0x1b   :  { %s362_s20 = scalar_lea.vmem %s490_s24, 256  ;;  %p367_p12 = scmp.lt.s32.totalorder %s490_s24, %s490_s24 }
  0x1c   :  { %p363_p11 = scmp.ne.s32.totalorder %s490_s24, %s362_s20  ;;  %p368_p13 = scmp.lt.s32.totalorder %s362_s20, %s362_s20 }
  0x1e   :  { %p369_p0 = por %p368_p13, %p367_p12 }
  0x20   :  { %p370_p1 = pnand %p369_p0, %p363_p11 }
  0x22   :  { %373 = shalt.err (!%p370_p1)
}
  0x23   :  { %26 = dma.hbm_to_vmem [thread:$0]  %s609_s0, 256, %s490_s24, [#allocation3], %s450_s9, %s450_s9, %s451_s10  }
  0x24   :  { %s452_s22 = smov [#allocation7]   ;;  %s453_s25 = smov [#allocation8]  }
  0x25   :  { %s45_s23 = sshll.u32 %s452_s22, 4  ;;  %s55_s26 = sshll.u32 %s453_s25, 4  ;;  %s46_s23 = int_to_ptr.vmem [resolvable:$true] %s45_s23  ;;  %s56_s26 = int_to_ptr.vmem [resolvable:$true] %s55_s26 }
  0x26   :  { %s374_s29 = scalar_lea.hbm %s611_s2, 64 }
  0x27   :  { %p375_p2 = scmp.ne.s32.totalorder %s611_s2, %s374_s29  ;;  %p378_p3 = scmp.lt.u32.totalorder %s374_s29, %s611_s2 }
  0x29   :  { %p380_p4 = pnand %p378_p3, %p375_p2 }
  0x2b   :  { %383 = shalt.err (!%p380_p4)
}
  0x2c   :  { %s384_s0 = scalar_lea.vmem %s46_s23, 64  ;;  %p389_p6 = scmp.lt.s32.totalorder %s46_s23, %s46_s23 }
  0x2d   :  { %p385_p5 = scmp.ne.s32.totalorder %s46_s23, %s384_s0  ;;  %p390_p7 = scmp.lt.s32.totalorder %s384_s0, %s384_s0 }
  0x2f   :  { %p391_p8 = por %p390_p7, %p389_p6 }
  0x31   :  { %p392_p9 = pnand %p391_p8, %p385_p5 }
  0x33   :  { %395 = shalt.err (!%p392_p9)
}
  0x34   :  { %48 = dma.hbm_to_vmem [thread:$0]  %s611_s2, 64, %s46_s23, [#allocation6]  }
  0x35   :  { %s396_s13 = scalar_lea.hbm %s612_s3, 32 }
  0x36   :  { %p397_p10 = scmp.ne.s32.totalorder %s612_s3, %s396_s13  ;;  %p400_p11 = scmp.lt.u32.totalorder %s396_s13, %s612_s3 }
  0x38   :  { %p402_p12 = pnand %p400_p11, %p397_p10 }
  0x3a   :  { %405 = shalt.err (!%p402_p12)
}
  0x3b   :  { %s406_s18 = scalar_lea.vmem %s56_s26, 32  ;;  %p411_p0 = scmp.lt.s32.totalorder %s56_s26, %s56_s26 }
  0x3c   :  { %p407_p13 = scmp.ne.s32.totalorder %s56_s26, %s406_s18  ;;  %p412_p1 = scmp.lt.s32.totalorder %s406_s18, %s406_s18 }
  0x3e   :  { %p413_p2 = por %p412_p1, %p411_p0 }
  0x40   :  { %p414_p3 = pnand %p413_p2, %p407_p13 }
  0x42   :  { %417 = shalt.err (!%p414_p3)
}
  0x43   :  { %58 = dma.hbm_to_vmem [thread:$0]  %s612_s3, 32, %s56_s26, [#allocation9]  }
  0x44   :  { %440 = dma.done.wait [#allocation3], 256  }
  0x45   :  { %441 = vsyncadd [#allocation3], 4294967040 }
  0x46   :  { %442 = dma.done.wait [#allocation6], 320  }
  0x47   :  { %443 = vsyncadd [#allocation6], 4294966976 }
  0x48   :  { %444 = dma.done.wait [#allocation9], 32  }
  0x49   :  { %445 = vsyncadd [#allocation9], 4294967264  ;;  %v75_v0 = vld [vmem:[#allocation2] sm:$0xff]  ;;  %v76_v1 = vld [vmem:[#allocation2 + $0x8] sm:$0x1]  ;;  %vm81_vm0 = vcmask 850944   ;;  %v162_v18 = vlaneseq }
  0x4a   :  { %v77_v2 = vld [vmem:[#allocation5] sm:$0xff]  ;;  %vm83_vm1 = vcmask 843776   ;;  %v78_v3 = vld [vmem:[#allocation5 + $0x8] sm:$0x1]  ;;  %v127_v5 = vld [vmem:[#allocation7] sm:$0x3] }
  0x4b   :  { %v79_v4 = vmul.f32 %v77_v2, %v75_v0  ;;  %v128_v6 = vld [vmem:[#allocation7 + $0x2] sm:$0x1]  ;;  %v80_v7 = vmul.f32 %v78_v3, %v76_v1  ;;  %v129_v8 = vld [vmem:[#allocation8] sm:$0x3]  ;;  %vm132_vm2 = vcmask 123904   ;;  %v552_v26 = vshrl.u32 %v162_v18, 7 }
  0x4c   :  { %v140_v9 = vmul.f32 -0.5, %v128_v6  ;;  %v130_v11 = vsub.f32 %v127_v5, %v129_v8  ;;  %v168_v20 = vld [vmem:[%s613_s4] sm:$0x1f]  ;;  %v554_v28 = vand.u32 127, %v162_v18  ;;  %vm147_vm5 = vcmask 122880   ;;  %s454_s4 = smov [#allocation10]  }
  0x4d   :  { %v82_v10 = vsel %vm81_vm0, %v79_v4, 0.0  ;;  %v84_v12 = vsel %vm83_vm1, %v80_v7, 0.0  ;;  %v169_v21 = vld [vmem:[%s614_s5] sm:$0x1f]  ;;  %v188_v33 = vsub.s32 2, %v552_v26  ;;  %v192_v37 = vsub.s32 3, %v552_v26 }
  0x4e   :  { %v141_v13 = vmul.f32 1.442695, %v140_v9  ;;  %v85_v14 = vadd.f32 %v84_v12, %v82_v10  ;;  %v131_v15 = vmul.f32 %v130_v11, %v130_v11  ;;  %v170_v25 = vsub.f32 %v168_v20, %v169_v21  ;;  %s304_s5 = sshll.u32 %s454_s4, 4  ;;  %s305_s5 = int_to_ptr.vmem [resolvable:$true] %s304_s5 }
  0x4f   :  { %v560_v36 = vadd.s32 256, %v554_v28  ;;  %v196_v39 = vsub.s32 4, %v552_v26  ;;  %v567_v42 = vadd.s32 512, %v554_v28  ;;  %vm208_vm6 = vcmask 1040384   ;;  %s418_s22 = scalar_lea.vmem %s305_s5, 16  ;;  %s422_s23 = scalar_lea.vmem %s305_s5, 32 }
  0x50   :  { %324 = vpow2.f32 %v141_v13  ;;  %v86_v16 = vrot.slane %v85_v14, 4  ;;  %v133_v17 = vsel %vm132_vm2, %v131_v15, 0.0  ;;  %v171_v32 = vand.u32 2147483647, %v170_v25  ;;  %p419_p4 = scmp.ne.s32.totalorder %s305_s5, %s418_s22  ;;  %p423_p5 = scmp.lt.s32.totalorder %s305_s5, %s305_s5 }
  0x51   :  { %v134_v19 = vrot.slane %v133_v17, 4  ;;  %vm224_vm3 = vcmp.ge.s32.totalorder %v560_v36, 312  ;;  %vm231_vm4 = vcmp.lt.s32.totalorder %v567_v42, 564  ;;  %vm152_vm7 = vcmask 130048   ;;  %p424_p6 = scmp.lt.s32.totalorder %s422_s23, %s418_s22 }
  0x52   :  { %v87_v22 = vadd.f32 %v86_v16, %v85_v14  ;;  %v189_v44 = vrot.slane %v171_v32, %v188_v33  ;;  %v193_v46 = vrot.slane %v171_v32, %v192_v37  ;;  %v570_v48 = vrot.slane %v171_v32, %v196_v39 }
  0x53   :  { %v135_v23 = vadd.f32 %v134_v19, %v133_v17  ;;  %vm216_vm8 = vcmask 581632   ;;  %v180_v11 = vsub.s32 0, %v552_v26  ;;  %v184_v12 = vsub.s32 1, %v552_v26  ;;  %p425_p7 = por %p424_p6, %p423_p5 }
  0x54   :  { %v88_v24 = vrot.slane %v87_v22, 2  ;;  %v239_v49 = vsel %vm224_vm3, %v189_v44, 0.0  ;;  %v247_v54 = vsel %vm208_vm6, %v193_v46, 0.0  ;;  %v241_v56 = vsel %vm231_vm4, %v570_v48, 0.0 }
  0x55   :  { %v136_v27 = vrot.slane %v135_v23, 2  ;;  %v245_v53 = vsel %vm208_vm6, %v239_v49, 0.0  ;;  %v249_v62 = vsel %vm216_vm8, %v241_v56, 0.0  ;;  %v181_v17 = vrot.slane %v171_v32, %v180_v11  ;;  %p426_p8 = pnand %p425_p7, %p419_p4 }
  0x56   :  { %v89_v29 = vadd.f32 %v88_v24, %v87_v22  ;;  %v248_v59 = vadd.f32 %v247_v54, %v245_v53  ;;  %v185_v18 = vrot.slane %v171_v32, %v184_v12  ;;  %vm174_vm11 = vcmp.lt.s32.totalorder %v560_v36, 312 }
  0x57   :  { %v137_v30 = vadd.f32 %v136_v27, %v135_v23  ;;  %v209_v22 = vsel %vm208_vm6, %v181_v17, 0.0  ;;  %v205_v25 = vsel %vm174_vm11, %v189_v44, 0.0  ;;  %vm258_vm13 = vcmp.ge.s32.totalorder %v567_v42, 564 }
  0x58   :  { %v90_v31 = vrot.slane %v89_v29, 1  ;;  %v250_v1 = vadd.f32 %v249_v62, %v248_v59  ;;  %v210_v23 = vsel %vm208_vm6, %v185_v18, 0.0  ;;  %vm276_vm14 = vcmp.eq.s32.totalorder %v554_v28, 0 }
  0x59   :  { %v138_v35 = vrot.slane %v137_v30, 1  ;;  %v211_v27 = vadd.f32 %v210_v23, %v209_v22  ;;  %vm278_vm15 = vcmp.eq.s32.totalorder %v554_v28, 1  ;;  %vm284_vm1 = vcmp.eq.s32.totalorder %v554_v28, 3 }
  0x5a   :  { %v557_v34 = vpop.eup %324  ;;  %v91_v38 = vadd.f32 %v90_v31, %v89_v29  ;;  %v212_v29 = vsel %vm208_vm6, %v205_v25, 0.0  ;;  %vm287_vm2 = vcmp.eq.s32.totalorder %v554_v28, 4  ;;  %vm290_vm3 = vcmp.eq.s32.totalorder %v554_v28, 5 }
  0x5b   :  { %v139_v40 = vadd.f32 %v138_v35, %v137_v30  ;;  %v144_v41 = vmul.f32 %v557_v34, %v557_v34  ;;  %v213_v32 = vadd.f32 %v212_v29, %v211_v27  ;;  %v263_v35 = vsel %vm258_vm13, %v570_v48, 0.0 }
  0x5c   :  { %v315_v43 = vadd.f32 -1.0, %v91_v38  ;;  %v271_v36 = vsel %vm216_vm8, %v263_v35, 0.0  ;;  %vm293_vm4 = vcmp.eq.s32.totalorder %v554_v28, 6 }
  0x5d   :  { %v143_v45 = vmul.f32 0.5, %v139_v40  ;;  %v153_v61 = vsel %vm152_vm7, %v139_v40, 0.0 }
  0x5e   :  { %v93_v47 = vmul.f32 0.5, %v315_v43 }
  0x5f   :  { %v145_v50 = vmul.f32 %v144_v41, %v143_v45 }
  0x60   :  { %v316_v51 = vclamps-f32 %v93_v47, 0.999999 }
  0x61   :  { %v146_v52 = vadd.f32 %v145_v50, %v128_v6 }
  0x62   :  { %v96_v55 = vand.u32 2147483647, %v316_v51  ;;  %vm120_vm12 = vcmp.lt.f32.partialorder %v316_v51, 0.0 }
  0x63   :  { %v148_v57 = vsel %vm147_vm5, %v146_v52, 0.0 }
  0x64   :  { %v97_v58 = vmul.f32 -0.0012624911, %v96_v55  ;;  %149 = vadd.xlane.f32.xlu1 %v148_v57  ;;  %v111_v60 = vsub.f32 1.0, %v96_v55 }
  0x66   :  { %v98_v63 = vadd.f32 0.00667009, %v97_v58  ;;  %326 = vrsqrt.f32 %v111_v60  ;;  %vm114_vm9 = vcmp.eq.f32.partialorder %v111_v60, inf  ;;  %v117_v14 = vand.u32 2147483648, %v111_v60 }
  0x67   :  { %vm116_vm10 = vcmp.eq.f32.partialorder %v111_v60, 0.0  ;;  %328 = vrcp.f32 %v557_v34 }
  0x68   :  { %v99_v0 = vmul.f32 %v98_v63, %v96_v55  ;;  %154 = vadd.xlane.f32.xlu1 %v153_v61 }
  0x6a   :  { %v100_v2 = vadd.f32 -0.017088126, %v99_v0 }
  0x6c   :  { %v101_v3 = vmul.f32 %v100_v2, %v96_v55  ;;  %251 = vadd.xlane.f32.xlu1 %v250_v1 }
  0x6e   :  { %v102_v4 = vadd.f32 0.03089188, %v101_v3 }
  0x70   :  { %v103_v5 = vmul.f32 %v102_v4, %v96_v55  ;;  %v327_v7 = vpop.eup %326 }
  0x71   :  { %v113_v10 = vmul.f32 %v327_v7, %v111_v60  ;;  %v329_v33 = vpop.eup %328 }
  0x72   :  { %v104_v6 = vadd.f32 -0.050174303, %v103_v5  ;;  %v158_v34 = vsel %vm147_vm5, %v329_v33, 0.0  ;;  %vm296_vm5 = vcmask 57344  }
  0x73   :  { %v115_v16 = vsel %vm114_vm9, %v111_v60, %v113_v10 }
  0x74   :  { %v105_v8 = vmul.f32 %v104_v6, %v96_v55  ;;  %v118_v20 = vsel %vm116_vm10, %v117_v14, %v115_v16 }
  0x76   :  { %v106_v9 = vadd.f32 0.08897899, %v105_v8 }
  0x78   :  { %v107_v13 = vmul.f32 %v106_v9, %v96_v55 }
  0x7a   :  { %v108_v15 = vadd.f32 -0.2145988, %v107_v13 }
  0x7c   :  { %v109_v19 = vmul.f32 %v108_v15, %v96_v55 }
  0x7e   :  { %v110_v21 = vadd.f32 1.5707963, %v109_v19 }
  0x80   :  { %v119_v24 = vmul.f32 %v118_v20, %v110_v21 }
  0x82   :  { %v121_v26 = vsub.f32 3.1415927, %v119_v24 }
  0x84   :  { %v122_v30 = vsel %vm120_vm12, %v121_v26, %v119_v24 }
  0x85   :  { %v123_v31 = vsel %vm81_vm0, %v122_v30, 0.0  ;;  %vm281_vm0 = vcmp.eq.s32.totalorder %v554_v28, 2 }
  0x86   :  { %124 = vadd.xlane.f32.xlu0 %v123_v31 }
  0x8a   :  { %219 = vadd.xlane.f32.xlu0 %v213_v32 }
  0x8e   :  { %159 = vadd.xlane.f32.xlu0 %v158_v34 }
  0x92   :  { %273 = vadd.xlane.f32.xlu0 %v271_v36 }
  0xf1   :  { %v150_v37 = vpop.xlane.xlu1 %149 }
  0xf2   :  { %v151_v43 = vmul.f32 0.0625, %v150_v37 }
  0xf4   :  { %v282_v50 = vsel %vm281_vm0, %v151_v43, 0.0 }
  0xf5   :  { %v155_v39 = vpop.xlane.xlu1 %154 }
  0xf6   :  { %v156_v44 = vmul.f32 0.03125, %v155_v39 }
  0xf8   :  { %v285_v51 = vsel %vm284_vm1, %v156_v44, 0.0 }
  0xf9   :  { %v252_v45 = vpop.xlane.xlu1 %251 }
  0xfa   :  { %v253_v53 = vmul.f32 0.003968254, %v252_v45 }
  0xfc   :  { %v291_v58 = vsel %vm290_vm3, %v253_v53, 0.0 }
 0x113   :  { %v125_v38 = vpop.xlane.xlu0 %124 }
 0x114   :  { %v126_v40 = vmul.f32 0.009615385, %v125_v38 }
 0x116   :  { %v277_v46 = vsel %vm276_vm14, %v126_v40, 0.0 }
 0x117   :  { %v220_v41 = vpop.xlane.xlu0 %219 }
 0x118   :  { %v221_v42 = vmul.f32 0.009615385, %v220_v41 }
 0x11a   :  { %v279_v47 = vsel %vm278_vm15, %v221_v42, 0.0 }
 0x11b   :  { %v280_v48 = vadd.f32 %v279_v47, %v277_v46  ;;  %v160_v49 = vpop.xlane.xlu0 %159 }
 0x11c   :  { %v161_v52 = vmul.f32 0.0625, %v160_v49 }
 0x11d   :  { %v283_v54 = vadd.f32 %v282_v50, %v280_v48 }
 0x11e   :  { %v288_v55 = vsel %vm287_vm2, %v161_v52, 0.0 }
 0x11f   :  { %v286_v56 = vadd.f32 %v285_v51, %v283_v54  ;;  %v274_v57 = vpop.xlane.xlu0 %273 }
 0x120   :  { %v275_v59 = vmul.f32 0.05, %v274_v57 }
 0x121   :  { %v289_v60 = vadd.f32 %v288_v55, %v286_v56 }
 0x122   :  { %v294_v61 = vsel %vm293_vm4, %v275_v59, 0.0 }
 0x123   :  { %v292_v62 = vadd.f32 %v291_v58, %v289_v60 }
 0x125   :  { %v295_v63 = vadd.f32 %v294_v61, %v292_v62 }
 0x127   :  { %297 = vst.msk [vmem:[#allocation10] sm:$0x1] %vm296_vm5, %v295_v63 }
 0x128   :  { %429 = shalt.err (!%p426_p8)
}
 0x129   :  { %s430_s27 = scalar_lea.hbm %s615_s6, 16 }
 0x12a   :  { %p431_p9 = scmp.ne.s32.totalorder %s615_s6, %s430_s27  ;;  %p434_p10 = scmp.lt.u32.totalorder %s430_s27, %s615_s6 }
 0x12c   :  { %p436_p11 = pnand %p434_p10, %p431_p9 }
 0x12e   :  { %439 = shalt.err (!%p436_p11)
}
 0x12f   :  { %307 = dma.vmem_to_hbm [thread:$0]  %s305_s5, 16, %s615_s6, [#allocation4]  }
 0x130   :  { %446 = dma.done.wait [#allocation4], 16  }
 0x131   :  { %447 = vsyncadd [#allocation4], 4294967280 }
 0x132   :  { %311 = vsyncpa [#allocation3], 1 }
 0x133   :  { %312 = vsyncpa [#allocation6], 1 }
 0x134   :  { %313 = vsyncpa [#allocation9], 1 }
 0x135   :  { %314 = vsyncpa [#allocation4], 1 }

</bundles_post_ra>
